<compile_context>
chip_gen: v7x
topology: tpu7x:2x2x1
jax: 0.10.0
libtpu: 0.0.40
codegen_flags: <defaults>
</compile_context>

<pallas_src>
import jax
import jax.numpy as jnp
from jax.experimental import pallas as pl
from jax.experimental.pallas import tpu as pltpu


def _round_up(x, m):
    return ((x + m - 1) // m) * m


# ---------------------------------------------------------------------------
# Fused kernel: all hidden layers + final Linear, packed params
#   x_ref : (tm, d0)            input rows (row = (batch, feature) pair)
#   wb_ref: (n_layers, D+8, D)  slab i = [W_i^T (padded) ; row D = bias_i ; 0...]
#   ss_ref: (tm, D)             col 2i = BN scale_i, col 2i+1 = BN shift_i
#   o_ref : (tm, D)             lane-dense output, first seq_len cols are real
# ---------------------------------------------------------------------------
def _make_fused_decoder_kernel(n_hidden, d0, D):
    def kernel(x_ref, wb_ref, ss_ref, o_ref):
        h = x_ref[...]            # (tm, d0) activation, stays in vregs/VMEM
        ss = ss_ref[...]          # (tm, D)  per-row BN scale/shift, loaded once
        for i in range(n_hidden):
            # First layer contracts only the real d0 rows; later layers contract
            # the full D rows -- the zero-padded weight rows kill any garbage in
            # the padded lanes of h (tanh(shift) in lanes >= real d_out).
            k = d0 if i == 0 else D
            w = wb_ref[i, :k, :]                    # (k, D)
            b = wb_ref[i, D:D + 1, :]               # (1, D)  Linear bias
            y = jnp.dot(h, w, preferred_element_type=jnp.float32)
            scale = ss[:, 2 * i:2 * i + 1]          # (tm, 1)
            shift = ss[:, 2 * i + 1:2 * i + 2]      # (tm, 1)
            # eval-mode BatchNorm1d:  BN(z) = z*scale + shift ; Dropout = identity
            h = jnp.tanh((y + b) * scale + shift)
        wf = wb_ref[n_hidden, :D, :]
        bf = wb_ref[n_hidden, D:D + 1, :]
        y = jnp.dot(h, wf, preferred_element_type=jnp.float32) + bf
        o_ref[...] = y.astype(o_ref.dtype)          # single unmasked (tm, D) store

    return kernel


# ---------------------------------------------------------------------------
# Forward builder (jitted wrapper around the single pallas_call)
# ---------------------------------------------------------------------------
def build_decoder_forward(layersizes, seq_len, n_features, D):
    d0 = layersizes[0]
    n_hidden = len(layersizes) - 1
    kernel = _make_fused_decoder_kernel(n_hidden, d0, D)

    def forward(x, wb, ss_chan):
        B = x.shape[0]
        M = B * n_features
        h2d = x.reshape(M, d0)
        # Row r of the flattened (B*F, d0) activation belongs to channel r % F,
        # which is exactly what tiling the per-channel (F, D) slab B times gives.
        ss = jnp.tile(ss_chan, (B, 1))              # (M, D)

        # Row tiling: single block for tiny M; cap tm so double-buffered
        # (tm, d0)+(tm, D) in / (tm, D) out tiles stay << v7x 32 MiB scoped VMEM.
        tm = M if M <= 256 else 256
        grid = (pl.cdiv(M, tm),)

        out = pl.pallas_call(
            kernel,
            out_shape=jax.ShapeDtypeStruct((M, D), jnp.float32),
            grid=grid,
            in_specs=[
                pl.BlockSpec((tm, d0), lambda i: (i, 0)),
                pl.BlockSpec(wb.shape, lambda i: (0, 0, 0)),   # resident params
                pl.BlockSpec((tm, D), lambda i: (i, 0)),
            ],
            out_specs=pl.BlockSpec((tm, D), lambda i: (i, 0)),
            compiler_params=pltpu.CompilerParams(
                dimension_semantics=("parallel",)),            # 2nd TC on v7x
        )(h2d, wb, ss)
        return out[:, :seq_len].reshape(B, n_features, seq_len)

    return jax.jit(forward)


# ---------------------------------------------------------------------------
# One-time parameter preparation (batch-size independent)
# ---------------------------------------------------------------------------
def prepare_params(hidden_params, final_params, n_features, layersizes, seq_len,
                   eps=1e-5):
    """Pack transposed/padded weights+biases into one slab and eval-BN
    scale/shift into one per-channel slab."""
    n_hidden = len(layersizes) - 1
    D = _round_up(max(list(layersizes[1:]) + [seq_len, 128]), 128)
    assert 2 * n_hidden <= D, "too many hidden layers for scale/shift packing"
    rows = D + 8  # D weight rows + 1 bias row, padded to a sublane multiple

    slabs = []
    for i, p in enumerate(hidden_params):
        d_in, d_out = layersizes[i], layersizes[i + 1]
        slab = jnp.zeros((rows, D), jnp.float32)
        slab = slab.at[:d_in, :d_out].set(jnp.asarray(p["W"]).T)
        slab = slab.at[D, :d_out].set(jnp.asarray(p["b"]))
        slabs.append(slab)
    Wf, bf = final_params
    d_in = layersizes[-1]
    slab = jnp.zeros((rows, D), jnp.float32)
    slab = slab.at[:d_in, :seq_len].set(jnp.asarray(Wf).T)
    slab = slab.at[D, :seq_len].set(jnp.asarray(bf))
    slabs.append(slab)
    wb = jnp.stack(slabs)                                   # (n_layers, D+8, D)

    ss_chan = jnp.zeros((n_features, D), jnp.float32)       # per-channel, no B
    for i, p in enumerate(hidden_params):
        scale_c = p["gamma"] / jnp.sqrt(p["rvar"] + eps)
        shift_c = p["beta"] - p["rmean"] * scale_c
        ss_chan = ss_chan.at[:, 2 * i].set(scale_c)
        ss_chan = ss_chan.at[:, 2 * i + 1].set(shift_c)

    return jax.device_put(wb), jax.device_put(ss_chan), D


# ---------------------------------------------------------------------------
# Parameter construction (deterministic, mimics nn.Linear / BatchNorm1d shapes)
# ---------------------------------------------------------------------------
def init_params(key, layersizes, seq_len, n_features):
    sizes = list(layersizes)
    hidden = []
    for i in range(len(sizes) - 1):
        fan_in, fan_out = sizes[i], sizes[i + 1]
        key, k1, k2, k3, k4, k5, k6 = jax.random.split(key, 7)
        bound = 1.0 / jnp.sqrt(jnp.float32(fan_in))
        hidden.append(
            dict(
                W=jax.random.uniform(k1, (fan_out, fan_in), jnp.float32, -bound, bound),
                b=jax.random.uniform(k2, (fan_out,), jnp.float32, -bound, bound),
                gamma=1.0 + 0.1 * jax.random.normal(k3, (n_features,), jnp.float32),
                beta=0.1 * jax.random.normal(k4, (n_features,), jnp.float32),
                rmean=0.1 * jax.random.normal(k5, (n_features,), jnp.float32),
                rvar=1.0 + 0.1 * jax.random.uniform(k6, (n_features,), jnp.float32),
            )
        )
    fan_in = sizes[-1]
    key, k1, k2 = jax.random.split(key, 3)
    bound = 1.0 / jnp.sqrt(jnp.float32(fan_in))
    Wf = jax.random.uniform(k1, (seq_len, fan_in), jnp.float32, -bound, bound)
    bf = jax.random.uniform(k2, (seq_len,), jnp.float32, -bound, bound)
    return hidden, (Wf, bf)


# ---------------------------------------------------------------------------
# Pure-JAX reference (matches PyTorch eval-mode semantics)
# ---------------------------------------------------------------------------
def decoder_forward_ref(x, hidden_params, final_params, eps=1e-5):
    h = x
    for p in hidden_params:
        h = jnp.einsum("bfl,ol->bfo", h, p["W"]) + p["b"]
        scale = (p["gamma"] / jnp.sqrt(p["rvar"] + eps))[None, :, None]
        shift = (p["beta"] - p["rmean"] * p["gamma"] / jnp.sqrt(p["rvar"] + eps))[None, :, None]
        h = jnp.tanh(h * scale + shift)
    Wf, bf = final_params
    return jnp.einsum("bfl,ol->bfo", h, Wf) + bf


if __name__ == "__main__":
    # Small shapes consistent with the module:
    #   seq_len=12, n_features=4, decoder layersizes=[8, 16, 32]
    #   input x: (batch=2, n_features=4, layersizes[0]=8) -> output (2, 4, 12)
    seq_len, n_features = 12, 4
    layersizes = [8, 16, 32]
    B = 2

    key = jax.random.PRNGKey(0)
    key, kx, kp = jax.random.split(key, 3)
    x = jax.random.normal(kx, (B, n_features, layersizes[0]), jnp.float32)
    hidden_params, final_params = init_params(kp, layersizes, seq_len, n_features)

    # One-time prep: pack padded W^T + bias slabs, per-channel BN scale/shift.
    wb, ss_chan, D = prepare_params(hidden_params, final_params,
                                    n_features, layersizes, seq_len)
    decoder_forward = build_decoder_forward(layersizes, seq_len, n_features, D)

    out = decoder_forward(x, wb, ss_chan)
    out = jax.block_until_ready(out)

    ref = decoder_forward_ref(x, hidden_params, final_params)
    assert out.shape == (B, n_features, seq_len), out.shape
    assert jnp.allclose(out, ref, atol=1e-5, rtol=1e-5), "mismatch vs JAX reference"

    print("KERNEL_OK")
</pallas_src>

<mosaic_0001>
module attributes {stable_mosaic.version = 11 : i64} {
  func.func @kernel(%arg0: i32, %arg1: memref<8x8xf32, #tpu.memory_space<vmem>>, %arg2: memref<3x136x128xf32, #tpu.memory_space<vmem>>, %arg3: memref<8x128xf32, #tpu.memory_space<vmem>>, %arg4: memref<8x128xf32, #tpu.memory_space<vmem>>) attributes {dimension_semantics = [#tpu.dimension_semantics<parallel>], iteration_bounds = array<i64: 1>, scalar_prefetch = 0 : i64, scratch_operands = 0 : i64, tpu.core_type = #tpu.core_type<tc>, window_params = [{transform_indices = @transform_0, window_bounds = array<i64: 8, 8>}, {pipeline_mode = #tpu.pipeline_mode<synchronous>, transform_indices = @transform_1, window_bounds = array<i64: 3, 136, 128>}, {transform_indices = @transform_2, window_bounds = array<i64: 8, 128>}, {transform_indices = @transform_3, window_bounds = array<i64: 8, 128>}]} {
    %c0 = arith.constant 0 : index
    %c0_0 = arith.constant 0 : index
    %0 = vector.load %arg1[%c0, %c0_0] : memref<8x8xf32, #tpu.memory_space<vmem>>, vector<8x8xf32>
    %c0_1 = arith.constant 0 : index
    %c0_2 = arith.constant 0 : index
    %1 = vector.load %arg3[%c0_1, %c0_2] : memref<8x128xf32, #tpu.memory_space<vmem>>, vector<8x128xf32>
    %c0_3 = arith.constant 0 : index
    %c0_4 = arith.constant 0 : index
    %c0_5 = arith.constant 0 : index
    %2 = vector.load %arg2[%c0_3, %c0_4, %c0_5] : memref<3x136x128xf32, #tpu.memory_space<vmem>>, vector<1x8x128xf32>
    %3 = vector.shape_cast %2 : vector<1x8x128xf32> to vector<8x128xf32>
    %c0_6 = arith.constant 0 : index
    %c128 = arith.constant 128 : index
    %c0_7 = arith.constant 0 : index
    %4 = vector.load %arg2[%c0_6, %c128, %c0_7] : memref<3x136x128xf32, #tpu.memory_space<vmem>>, vector<1x1x128xf32>
    %5 = vector.shape_cast %4 : vector<1x1x128xf32> to vector<1x128xf32>
    %cst = arith.constant dense<0.000000e+00> : vector<8x128xf32>
    %6 = tpu.matmul %0, %3, %cst {dimension_numbers = #tpu.dot_dimension_numbers<[1], [0], [0], [1], [0, 0, 1, 1], [], []>} : vector<8x8xf32>, vector<8x128xf32>, vector<8x128xf32> -> vector<8x128xf32>
    %7 = vector.extract_strided_slice %1 {offsets = [0, 0], sizes = [8, 1], strides = [1, 1]} : vector<8x128xf32> to vector<8x1xf32>
    %8 = vector.extract_strided_slice %1 {offsets = [0, 1], sizes = [8, 1], strides = [1, 1]} : vector<8x128xf32> to vector<8x1xf32>
    %9 = vector.broadcast %5 : vector<1x128xf32> to vector<8x128xf32>
    %10 = arith.addf %6, %9 : vector<8x128xf32>
    %11 = vector.broadcast %7 : vector<8x1xf32> to vector<8x128xf32>
    %12 = arith.mulf %10, %11 : vector<8x128xf32>
    %13 = vector.broadcast %8 : vector<8x1xf32> to vector<8x128xf32>
    %14 = arith.addf %12, %13 : vector<8x128xf32>
    %15 = math.tanh %14 : vector<8x128xf32>
    %c1 = arith.constant 1 : index
    %c0_8 = arith.constant 0 : index
    %c0_9 = arith.constant 0 : index
    %16 = vector.load %arg2[%c1, %c0_8, %c0_9] : memref<3x136x128xf32, #tpu.memory_space<vmem>>, vector<1x128x128xf32>
    %17 = vector.shape_cast %16 : vector<1x128x128xf32> to vector<128x128xf32>
    %c1_10 = arith.constant 1 : index
    %c128_11 = arith.constant 128 : index
    %c0_12 = arith.constant 0 : index
    %18 = vector.load %arg2[%c1_10, %c128_11, %c0_12] : memref<3x136x128xf32, #tpu.memory_space<vmem>>, vector<1x1x128xf32>
    %19 = vector.shape_cast %18 : vector<1x1x128xf32> to vector<1x128xf32>
    %cst_13 = arith.constant dense<0.000000e+00> : vector<8x128xf32>
    %20 = tpu.matmul %15, %17, %cst_13 {dimension_numbers = #tpu.dot_dimension_numbers<[1], [0], [0], [1], [0, 0, 1, 1], [], []>} : vector<8x128xf32>, vector<128x128xf32>, vector<8x128xf32> -> vector<8x128xf32>
    %21 = vector.extract_strided_slice %1 {offsets = [0, 2], sizes = [8, 1], strides = [1, 1]} : vector<8x128xf32> to vector<8x1xf32>
    %22 = vector.extract_strided_slice %1 {offsets = [0, 3], sizes = [8, 1], strides = [1, 1]} : vector<8x128xf32> to vector<8x1xf32>
    %23 = vector.broadcast %19 : vector<1x128xf32> to vector<8x128xf32>
    %24 = arith.addf %20, %23 : vector<8x128xf32>
    %25 = vector.broadcast %21 : vector<8x1xf32> to vector<8x128xf32>
    %26 = arith.mulf %24, %25 : vector<8x128xf32>
    %27 = vector.broadcast %22 : vector<8x1xf32> to vector<8x128xf32>
    %28 = arith.addf %26, %27 : vector<8x128xf32>
    %29 = math.tanh %28 : vector<8x128xf32>
    %c2 = arith.constant 2 : index
    %c0_14 = arith.constant 0 : index
    %c0_15 = arith.constant 0 : index
    %30 = vector.load %arg2[%c2, %c0_14, %c0_15] : memref<3x136x128xf32, #tpu.memory_space<vmem>>, vector<1x128x128xf32>
    %31 = vector.shape_cast %30 : vector<1x128x128xf32> to vector<128x128xf32>
    %c2_16 = arith.constant 2 : index
    %c128_17 = arith.constant 128 : index
    %c0_18 = arith.constant 0 : index
    %32 = vector.load %arg2[%c2_16, %c128_17, %c0_18] : memref<3x136x128xf32, #tpu.memory_space<vmem>>, vector<1x1x128xf32>
    %33 = vector.shape_cast %32 : vector<1x1x128xf32> to vector<1x128xf32>
    %cst_19 = arith.constant dense<0.000000e+00> : vector<8x128xf32>
    %34 = tpu.matmul %29, %31, %cst_19 {dimension_numbers = #tpu.dot_dimension_numbers<[1], [0], [0], [1], [0, 0, 1, 1], [], []>} : vector<8x128xf32>, vector<128x128xf32>, vector<8x128xf32> -> vector<8x128xf32>
    %35 = vector.broadcast %33 : vector<1x128xf32> to vector<8x128xf32>
    %36 = arith.addf %34, %35 : vector<8x128xf32>
    %c0_20 = arith.constant 0 : index
    %c0_21 = arith.constant 0 : index
    %37 = vector.load %arg4[%c0_20, %c0_21] : memref<8x128xf32, #tpu.memory_space<vmem>>, vector<8x128xf32>
    tpu.vector_store %arg4[%c0_20, %c0_21], %36 {strides = array<i32>} : memref<8x128xf32, #tpu.memory_space<vmem>>, vector<8x128xf32>,
    return
  }
  func.func @transform_0(%arg0: i32) -> (i32, i32) {
    %c0_i32 = arith.constant 0 : i32
    %c0_i32_0 = arith.constant 0 : i32
    return %arg0, %c0_i32 : i32, i32
  }
  func.func @transform_1(%arg0: i32) -> (i32, i32, i32) {
    %c0_i32 = arith.constant 0 : i32
    %c0_i32_0 = arith.constant 0 : i32
    %c0_i32_1 = arith.constant 0 : i32
    %c0_i32_2 = arith.constant 0 : i32
    return %c0_i32, %c0_i32_0, %c0_i32_1 : i32, i32, i32
  }
  func.func @transform_2(%arg0: i32) -> (i32, i32) {
    %c0_i32 = arith.constant 0 : i32
    %c0_i32_0 = arith.constant 0 : i32
    return %arg0, %c0_i32 : i32, i32
  }
  func.func @transform_3(%arg0: i32) -> (i32, i32) {
    %c0_i32 = arith.constant 0 : i32
    %c0_i32_0 = arith.constant 0 : i32
    return %arg0, %c0_i32 : i32, i32
  }
}

</mosaic_0001>

<bundles_post_ra>
// kernel: forward.1
= control target key start
LH: loop header
LB: loop body
LE: loop exit
PB: predicated region body
PF: predicated region fallthrough
CT: control target
= control target key end

     0   :  { %8 = vsyncpa [#allocation3], 0  ;;  %s651_s0 = inlined_call_operand.vmem [shape: f32[8,8], index: 0, kind: input, shape index: {}]   ;;  %s652_s1 = inlined_call_operand.hbm [shape: f32[3,136,128], index: 1, kind: input, shape index: {}]   ;;  %s653_s2 = inlined_call_operand.vmem [shape: f32[8,128], index: 2, kind: input, shape index: {}]   ;;  %s654_s3 = inlined_call_operand.hbm [shape: f32[8,128], index: 3, kind: output, shape index: {}]  }
   0x1   :  { %9 = vsyncpa [#allocation4], 0  ;;  %s565_s12 = smov [#allocation2]   ;;  %s517_s16 = scalar_lea.hbm %s652_s1, 6528 }
   0x2   :  { %s17_s13 = sshll.u32 %s565_s12, 4  ;;  %p518_p0 = scmp.ne.s32.totalorder %s652_s1, %s517_s16  ;;  %s18_s13 = int_to_ptr.vmem [resolvable:$true] %s17_s13 }
   0x3   :  { %p521_p1 = scmp.lt.u32.totalorder %s517_s16, %s652_s1 }
   0x5   :  { %p523_p2 = pnand %p521_p1, %p518_p0 }
   0x7   :  { %526 = shalt.err (!%p523_p2)
}
   0x8   :  { %s527_s21 = scalar_lea.vmem %s18_s13, 6528  ;;  %p532_p4 = scmp.lt.s32.totalorder %s18_s13, %s18_s13 }
   0x9   :  { %p528_p3 = scmp.ne.s32.totalorder %s18_s13, %s527_s21  ;;  %p533_p5 = scmp.lt.s32.totalorder %s527_s21, %s527_s21 }
   0xb   :  { %p534_p6 = por %p533_p5, %p532_p4 }
   0xd   :  { %p535_p7 = pnand %p534_p6, %p528_p3 }
   0xf   :  { %538 = shalt.err (!%p535_p7)
}
  0x10   :  { %s566_s22 = smov 128   ;;  %s567_s23 = smov 8  }
  0x11   :  { %23 = dma.hbm_to_vmem [thread:$0]  %s652_s1, 6528, %s18_s13, [#allocation3], %s566_s22, %s566_s22, %s567_s23  }
  0x12   :  { %561 = dma.done.wait [#allocation3], 6528  }
  0x13   :  { %562 = vsyncadd [#allocation3], 4294960768  ;;  %v568_v0 = vmov 0.0   ;;  %vm569_vm0 = vmmov 0   ;;  %v570_v1 = vmov 0   ;;  %v571_v2 = vmov 0.0|0.0  }
  0x14   :  { %374 = vmatprep.subr.mxu0 %v568_v0  ;;  %376 = vmatprep.mubr.msk.f32.mxu0 %vm569_vm0, %v568_v0  ;;  %vm37_vm1 = vcmask 64512   ;;  %v31_v3 = vld [vmem:[#allocation2] sm:$0xff]  ;;  %v124_v6 = vld [vmem:[#allocation2 + $0x88] sm:$0xff]  ;;  %v125_v7 = vld [vmem:[#allocation2 + $0x90] sm:$0xff]  ;;  %v572_v12 = vmov 1   ;;  %v573_v34 = vmov 2  }
  0x15   :  { %508 = vset.pattern.permute.xlu0 %v570_v1  ;;  %449 = vmatprep.subr.bf16.mxu1 %v571_v2  ;;  %v29_v4 = vld [vmem:[%s651_s0] sm:$0xff]  ;;  %v126_v8 = vld [vmem:[#allocation2 + $0x98] sm:$0xff]  ;;  %v450_v9 = vpack.c.bf16 %v125_v7, %v124_v6  ;;  %v128_v13 = vld [vmem:[#allocation2 + $0xa8] sm:$0xff]  ;;  %v574_v37 = vmov 3   ;;  %s575_s0 = smov [#allocation5]  }
  0x16   :  { %411 = vmatprep.mubr.msk.f32.mxu1 %vm569_vm0, %v568_v0  ;;  %v617_v5 = vld [vmem:[%s653_s2] sm:$0xff]  ;;  %375 = vmatpush3.msra.mxu0 %v31_v3  ;;  %v129_v14 = vld [vmem:[#allocation2 + $0xb0] sm:$0xff]  ;;  %v130_v16 = vld [vmem:[#allocation2 + $0xb8] sm:$0xff]  ;;  %s325_s2 = sshll.u32 %s575_s0, 4  ;;  %s326_s2 = int_to_ptr.vmem [resolvable:$true] %s325_s2 }
  0x17   :  { %113 = vperm.xlu0 %508, %v617_v5   ;;  %377 = vmatmul.mubr.msk.f32.vlgmr.msra.gmra.mrb[0].mxu0 %vm37_vm1, %v29_v4  ;;  %v127_v10 = vld [vmem:[#allocation2 + $0xa0] sm:$0xff]  ;;  %v456_v15 = vpack.c.bf16 %v129_v14, %v128_v13  ;;  %v132_v19 = vld [vmem:[#allocation2 + $0xc8] sm:$0xff]  ;;  %v133_v20 = vld [vmem:[#allocation2 + $0xd0] sm:$0xff]  ;;  %s539_s29 = scalar_lea.vmem %s326_s2, 128  ;;  %p544_p9 = scmp.lt.s32.totalorder %s326_s2, %s326_s2 }
  0x18   :  { %473 = vmatprep.subr.bf16.mxu0 %v571_v2  ;;  %446 = vmatprep.mubr.msk.f32.mxu0 %vm569_vm0, %v568_v0  ;;  %v453_v11 = vpack.c.bf16 %v127_v10, %v126_v8  ;;  %v131_v17 = vld [vmem:[#allocation2 + $0xc0] sm:$0xff]  ;;  %v462_v21 = vpack.c.bf16 %v133_v20, %v132_v19  ;;  %v134_v22 = vld [vmem:[#allocation2 + $0xd8] sm:$0xff]  ;;  %v136_v25 = vld [vmem:[#allocation2 + $0xe8] sm:$0xff]  ;;  %p540_p8 = scmp.ne.s32.totalorder %s326_s2, %s539_s29  ;;  %p545_p10 = scmp.lt.s32.totalorder %s539_s29, %s539_s29 }
  0x19   :  { %451 = vmatpush3.bf16.msra.mxu1 %v450_v9  ;;  %v459_v18 = vpack.c.bf16 %v131_v17, %v130_v16  ;;  %v135_v23 = vld [vmem:[#allocation2 + $0xe0] sm:$0xff]  ;;  %v137_v26 = vld [vmem:[#allocation2 + $0xf0] sm:$0xff]  ;;  %v138_v28 = vld [vmem:[#allocation2 + $0xf8] sm:$0xff]  ;;  %510 = vset.pattern.permute.xlu1 %v573_v34 }
  0x1a   :  { %452 = vmatprep.subr.bf16.mxu1 %v571_v2  ;;  %v465_v24 = vpack.c.bf16 %v135_v23, %v134_v22  ;;  %v468_v27 = vpack.c.bf16 %v137_v26, %v136_v25  ;;  %v139_v29 = vld [vmem:[#allocation2 + $0x100] sm:$0xff]  ;;  %v227_v31 = vld [vmem:[#allocation2 + $0x110] sm:$0xff]  ;;  %v228_v32 = vld [vmem:[#allocation2 + $0x118] sm:$0xff]  ;;  %216 = vperm.xlu1 %510, %v617_v5   ;;  %p546_p11 = por %p545_p10, %p544_p9 }
  0x1b   :  { %509 = vset.pattern.permute.xlu0 %v572_v12  ;;  %v471_v30 = vpack.c.bf16 %v139_v29, %v138_v28  ;;  %v229_v33 = vld [vmem:[#allocation2 + $0x120] sm:$0xff]  ;;  %v474_v35 = vpack.c.bf16 %v228_v32, %v227_v31  ;;  %v230_v36 = vld [vmem:[#allocation2 + $0x128] sm:$0xff]  ;;  %v231_v39 = vld [vmem:[#allocation2 + $0x130] sm:$0xff] }
  0x1c   :  { %118 = vperm.xlu0 %509, %v617_v5   ;;  %v477_v38 = vpack.c.bf16 %v230_v36, %v229_v33  ;;  %v232_v40 = vld [vmem:[#allocation2 + $0x138] sm:$0xff]  ;;  %v233_v42 = vld [vmem:[#allocation2 + $0x140] sm:$0xff]  ;;  %v234_v43 = vld [vmem:[#allocation2 + $0x148] sm:$0xff]  ;;  %p547_p12 = pnand %p546_p11, %p540_p8 }
  0x1d   :  { %454 = vmatpush3.bf16.msra.mxu1 %v453_v11  ;;  %475 = vmatpush3.bf16.msra.mxu0 %v474_v35  ;;  %v480_v41 = vpack.c.bf16 %v232_v40, %v231_v39  ;;  %v483_v44 = vpack.c.bf16 %v234_v43, %v233_v42  ;;  %v334_v46 = vld [vmem:[#allocation2 + $0x80] ss:$0 sm:$0xff]  ;;  %v235_v54 = vld [vmem:[#allocation2 + $0x150] sm:$0xff]  ;;  %v236_v55 = vld [vmem:[#allocation2 + $0x158] sm:$0xff] }
  0x1e   :  { %455 = vmatprep.subr.bf16.mxu1 %v571_v2  ;;  %476 = vmatprep.subr.bf16.mxu0 %v571_v2  ;;  %v486_v56 = vpack.c.bf16 %v236_v55, %v235_v54  ;;  %v237_v57 = vld [vmem:[#allocation2 + $0x160] sm:$0xff]  ;;  %v238_v58 = vld [vmem:[#allocation2 + $0x168] sm:$0xff]  ;;  %v239_v60 = vld [vmem:[#allocation2 + $0x170] sm:$0xff] }
  0x1f   :  { %511 = vset.pattern.permute.xlu1 %v574_v37  ;;  %v489_v59 = vpack.c.bf16 %v238_v58, %v237_v57  ;;  %v240_v61 = vld [vmem:[#allocation2 + $0x178] sm:$0xff]  ;;  %v241_v63 = vld [vmem:[#allocation2 + $0x180] sm:$0xff]  ;;  %v242_v0 = vld [vmem:[#allocation2 + $0x188] sm:$0xff] }
  0x20   :  { %512 = vset.pattern.permute.xlu0 %v574_v37  ;;  %221 = vperm.xlu1 %511, %v617_v5   ;;  %v492_v62 = vpack.c.bf16 %v240_v61, %v239_v60  ;;  %v495_v1 = vpack.c.bf16 %v242_v0, %v241_v63  ;;  %v336_v4 = vld [vmem:[#allocation2 + $0x108] ss:$0 sm:$0xff]  ;;  %v337_v12 = vld [vmem:[#allocation2 + $0x190] ss:$0 sm:$0xff] }
  0x21   :  { %457 = vmatpush3.bf16.msra.mxu1 %v456_v15  ;;  %478 = vmatpush3.bf16.msra.mxu0 %v477_v38 }
  0x22   :  { %458 = vmatprep.subr.bf16.mxu1 %v571_v2  ;;  %479 = vmatprep.subr.bf16.mxu0 %v571_v2 }
  0x25   :  { %460 = vmatpush3.bf16.msra.mxu1 %v459_v18  ;;  %481 = vmatpush3.bf16.msra.mxu0 %v480_v41 }
  0x26   :  { %461 = vmatprep.subr.bf16.mxu1 %v571_v2  ;;  %482 = vmatprep.subr.bf16.mxu0 %v571_v2 }
  0x29   :  { %463 = vmatpush3.bf16.msra.mxu1 %v462_v21  ;;  %484 = vmatpush3.bf16.msra.mxu0 %v483_v44 }
  0x2a   :  { %464 = vmatprep.subr.bf16.mxu1 %v571_v2  ;;  %485 = vmatprep.subr.bf16.mxu0 %v571_v2 }
  0x2d   :  { %466 = vmatpush3.bf16.msra.mxu1 %v465_v24  ;;  %487 = vmatpush3.bf16.msra.mxu0 %v486_v56 }
  0x2e   :  { %467 = vmatprep.subr.bf16.mxu1 %v571_v2  ;;  %488 = vmatprep.subr.bf16.mxu0 %v571_v2 }
  0x31   :  { %469 = vmatpush3.bf16.msra.mxu1 %v468_v27  ;;  %490 = vmatpush3.bf16.msra.mxu0 %v489_v59 }
  0x32   :  { %470 = vmatprep.subr.bf16.mxu1 %v571_v2  ;;  %491 = vmatprep.subr.bf16.mxu0 %v571_v2 }
  0x35   :  { %472 = vmatpush3.bf16.msra.mxu1 %v471_v30  ;;  %493 = vmatpush3.bf16.msra.mxu0 %v492_v62 }
  0x36   :  { %494 = vmatprep.subr.bf16.mxu0 %v571_v2 }
  0x39   :  { %496 = vmatpush3.bf16.msra.mxu0 %v495_v1 }
  0x96   :  { %v114_v45 = vpop.permute.xlu0 %113 }
  0x99   :  { %v217_v3 = vpop.permute.xlu1 %216 }
  0x9b   :  { %v119_v50 = vpop.permute.xlu0 %118 }
  0x9f   :  { %v222_v8 = vpop.permute.xlu1 %221 }
  0xea   :  { %v107_v47 = vpop.f32.mrb[0].mxu0 }
  0xeb   :  { %v108_v48 = vadd.f32 %v334_v46, %v107_v47  ;;  %v378_v49 = vpop.f32.mrb[1].mxu0 }
  0xed   :  { %v116_v51 = vmul.f32 %v114_v45, %v108_v48 }
  0xef   :  { %v121_v52 = vadd.f32 %v119_v50, %v116_v51 }
  0xf1   :  { %513 = vtanh.f32 %v121_v52 }
  0xfb   :  { %v514_v53 = vpop.eup %513 }
  0xfc   :  { %412 = vmatmul.mubr.f32.vlgmr.msra.gmra.mrb[0].mxu1 %v514_v53 }
 0x1cf   :  { %v211_v5 = vpop.f32.mrb[0].mxu1 }
 0x1d0   :  { %v212_v6 = vadd.f32 %v336_v4, %v211_v5  ;;  %v413_v7 = vpop.f32.mrb[1].mxu1 }
 0x1d2   :  { %v219_v9 = vmul.f32 %v217_v3, %v212_v6 }
 0x1d4   :  { %v224_v10 = vadd.f32 %v222_v8, %v219_v9 }
 0x1d6   :  { %515 = vtanh.f32 %v224_v10 }
 0x1e0   :  { %v516_v11 = vpop.eup %515 }
 0x1e1   :  { %447 = vmatmul.mubr.f32.vlgmr.msra.gmra.mrb[2].mxu0 %v516_v11 }
 0x2b4   :  { %v314_v13 = vpop.f32.mrb[2].mxu0 }
 0x2b5   :  { %v315_v14 = vadd.f32 %v337_v12, %v314_v13  ;;  %v448_v15 = vpop.f32.mrb[3].mxu0 }
 0x2b7   :  { %318 = vst [vmem:[#allocation5] sm:$0xff] %v315_v14 }
 0x2b8   :  { %550 = shalt.err (!%p547_p12)
}
 0x2b9   :  { %s551_s5 = scalar_lea.hbm %s654_s3, 128 }
 0x2ba   :  { %p552_p13 = scmp.ne.s32.totalorder %s654_s3, %s551_s5  ;;  %p555_p0 = scmp.lt.u32.totalorder %s551_s5, %s654_s3 }
 0x2bc   :  { %p557_p1 = pnand %p555_p0, %p552_p13 }
 0x2be   :  { %560 = shalt.err (!%p557_p1)
}
 0x2bf   :  { %328 = dma.vmem_to_hbm [thread:$0]  %s326_s2, 128, %s654_s3, [#allocation4]  }
 0x2c0   :  { %563 = dma.done.wait [#allocation4], 128  }
 0x2c1   :  { %564 = vsyncadd [#allocation4], 4294967168 }
 0x2c2   :  { %332 = vsyncpa [#allocation3], 1 }
 0x2c3   :  { %333 = vsyncpa [#allocation4], 1 }

</bundles_post_ra>
